<compile_context>
chip_gen: v7x
topology: tpu7x:2x2x1
jax: 0.10.0
libtpu: 0.0.40
codegen_flags: <defaults>
</compile_context>

<pallas_src>
import functools
import math

import jax
import jax.numpy as jnp
from jax.experimental import pallas as pl
from jax.experimental.pallas import tpu as pltpu


def _gcn_kernel(*refs, has_bias):
    """Grid = (row_tiles, k_tiles). Accumulates t = adj @ X over k, applies
    W (and bias) in the epilogue of the reduction."""
    if has_bias:
        adj_ref, x_ref, w_ref, b_ref, o_ref, acc_ref = refs
    else:
        adj_ref, x_ref, w_ref, o_ref, acc_ref = refs
        b_ref = None

    k = pl.program_id(1)

    @pl.when(k == 0)
    def _init():
        acc_ref[...] = jnp.zeros_like(acc_ref)

    # Reassociated: accumulate t = adj @ X (f32 accumulation on the MXU).
    acc_ref[...] += jnp.dot(
        adj_ref[...], x_ref[...], preferred_element_type=jnp.float32
    )

    @pl.when(k == pl.num_programs(1) - 1)
    def _epilogue():
        # out = t @ W (+ bias); W is tiny and VMEM-resident across the grid.
        out = jnp.dot(
            acc_ref[...].astype(w_ref.dtype),
            w_ref[...],
            preferred_element_type=jnp.float32,
        )
        if has_bias:
            out = out + b_ref[...]
        o_ref[...] = out.astype(o_ref.dtype)


def _round_up(x, m):
    return (x + m - 1) // m * m


def _pad2d(a, rows, cols):
    r, c = a.shape
    if r == rows and c == cols:
        return a
    return jnp.pad(a, ((0, rows - r), (0, cols - c)))


@functools.partial(
    jax.jit, static_argnames=("block_rows", "block_k", "compute_dtype")
)
def graph_convolution(
    x,
    adj,
    weight,
    bias=None,
    *,
    block_rows=128,
    block_k=128,
    compute_dtype=jnp.bfloat16,
):
    """Pallas GCN forward.

    x: [N, F_in], adj: [N, N] (dense), weight: [F_in, F_out],
    bias: [F_out] or None.  Returns [N, F_out] float32.
    """
    n, f_in = x.shape
    assert adj.shape == (n, n)
    assert weight.shape[0] == f_in
    f_out = weight.shape[1]
    has_bias = bias is not None

    # Pad N to a tile multiple (zero rows/cols contribute nothing and are
    # sliced off) and F_out to a multiple of 128 for lane-dense stores.
    n_p = _round_up(n, math.lcm(block_rows, block_k))
    f_out_p = _round_up(f_out, 128)

    adj_p = _pad2d(adj.astype(compute_dtype), n_p, n_p)
    x_p = _pad2d(x.astype(compute_dtype), n_p, f_in)
    w_p = _pad2d(weight.astype(compute_dtype), f_in, f_out_p)

    operands = [adj_p, x_p, w_p]
    in_specs = [
        # adj tile walks rows with i and columns with k (the reduction axis).
        pl.BlockSpec((block_rows, block_k), lambda i, k: (i, k)),
        # X rows follow the adj columns.
        pl.BlockSpec((block_k, f_in), lambda i, k: (k, 0)),
        # W: constant block index -> stays VMEM-resident across the grid.
        pl.BlockSpec((f_in, f_out_p), lambda i, k: (0, 0)),
    ]
    if has_bias:
        bias_p = _pad2d(bias.reshape(1, f_out).astype(jnp.float32), 1, f_out_p)
        operands.append(bias_p)
        in_specs.append(pl.BlockSpec((1, f_out_p), lambda i, k: (0, 0)))

    grid = (n_p // block_rows, n_p // block_k)

    out_p = pl.pallas_call(
        functools.partial(_gcn_kernel, has_bias=has_bias),
        out_shape=jax.ShapeDtypeStruct((n_p, f_out_p), jnp.float32),
        grid_spec=pltpu.PrefetchScalarGridSpec(
            num_scalar_prefetch=0,
            grid=grid,
            in_specs=in_specs,
            out_specs=pl.BlockSpec((block_rows, f_out_p), lambda i, k: (i, 0)),
            scratch_shapes=[pltpu.VMEM((block_rows, f_in), jnp.float32)],
        ),
        compiler_params=pltpu.CompilerParams(
            # Row-tile axis shards across TensorCores; reduction is sequential.
            dimension_semantics=("parallel", "arbitrary"),
        ),
    )(*operands)

    return out_p[:n, :f_out]


def init_gcn_params(key, in_features, out_features, bias=True):
    """Matches GraphConvolution.reset_parameters: uniform(-stdv, stdv),
    stdv = 1/sqrt(out_features)."""
    stdv = 1.0 / math.sqrt(out_features)
    kw, kb = jax.random.split(key)
    weight = jax.random.uniform(
        kw, (in_features, out_features), jnp.float32, minval=-stdv, maxval=stdv
    )
    b = (
        jax.random.uniform(
            kb, (out_features,), jnp.float32, minval=-stdv, maxval=stdv
        )
        if bias
        else None
    )
    return weight, b


if __name__ == "__main__":
    key = jax.random.PRNGKey(0)
    k_x, k_adj, k_p = jax.random.split(key, 3)

    # Big enough to exercise the (2, 2) tiled grid / reduction accumulator,
    # small enough to stay a quick test. F_OUT=64 exercises the lane-dense
    # padding path (padded to 128 inside the wrapper).
    N, F_IN, F_OUT = 256, 32, 64

    x = jax.random.normal(k_x, (N, F_IN), dtype=jnp.float32)

    # Symmetric, row-normalized adjacency (typical GCN preprocessing);
    # torch.spmm with a dense adj is just a dense matmul.
    a = (jax.random.uniform(k_adj, (N, N)) > 0.7).astype(jnp.float32)
    a = jnp.maximum(a, a.T) + jnp.eye(N, dtype=jnp.float32)
    adj = a / jnp.sum(a, axis=1, keepdims=True)

    weight, bias = init_gcn_params(k_p, F_IN, F_OUT, bias=True)

    # With-bias path.
    out = graph_convolution(x, adj, weight, bias)
    jax.block_until_ready(out)
    ref = adj @ (x @ weight) + bias[None, :]
    assert out.shape == (N, F_OUT)
    # bf16 MXU inputs with f32 accumulation -> slightly looser tolerance.
    assert jnp.allclose(out, ref, atol=1e-2, rtol=1e-2)

    # No-bias path (separate kernel variant, no zero-bias add).
    out_nb = graph_convolution(x, adj, weight, None)
    jax.block_until_ready(out_nb)
    ref_nb = adj @ (x @ weight)
    assert jnp.allclose(out_nb, ref_nb, atol=1e-2, rtol=1e-2)

    print("KERNEL_OK")
</pallas_src>

<mosaic_0001>
module attributes {stable_mosaic.version = 11 : i64} {
  func.func @_gcn_kernel(%arg0: i32, %arg1: i32, %arg2: memref<128x128xbf16, #tpu.memory_space<vmem>>, %arg3: memref<128x32xbf16, #tpu.memory_space<vmem>>, %arg4: memref<32x128xbf16, #tpu.memory_space<vmem>>, %arg5: memref<1x128xf32, #tpu.memory_space<vmem>>, %arg6: memref<128x128xf32, #tpu.memory_space<vmem>>, %arg7: memref<128x32xf32, #tpu.memory_space<vmem>>) attributes {dimension_semantics = [#tpu.dimension_semantics<parallel>, #tpu.dimension_semantics<arbitrary>], iteration_bounds = array<i64: 2, 2>, scalar_prefetch = 0 : i64, scratch_operands = 1 : i64, tpu.core_type = #tpu.core_type<tc>, window_params = [{transform_indices = @transform_0, window_bounds = array<i64: 128, 128>}, {transform_indices = @transform_1, window_bounds = array<i64: 128, 32>}, {pipeline_mode = #tpu.pipeline_mode<synchronous>, transform_indices = @transform_2, window_bounds = array<i64: 32, 128>}, {pipeline_mode = #tpu.pipeline_mode<synchronous>, transform_indices = @transform_3, window_bounds = array<i64: 1, 128>}, {transform_indices = @transform_4, window_bounds = array<i64: 128, 128>}]} {
    %c0_i32 = arith.constant 0 : i32
    %0 = arith.cmpi eq, %arg1, %c0_i32 : i32
    %1 = arith.extui %0 : i1 to i32
    %c0_i32_0 = arith.constant 0 : i32
    %2 = arith.cmpi ne, %1, %c0_i32_0 : i32
    scf.if %2 {
      %cst_9 = arith.constant 0.000000e+00 : f32
      %12 = vector.broadcast %cst_9 : f32 to vector<128x32xf32>
      %c0_10 = arith.constant 0 : index
      %c0_11 = arith.constant 0 : index
      %13 = vector.load %arg7[%c0_10, %c0_11] : memref<128x32xf32, #tpu.memory_space<vmem>>, vector<128x32xf32>
      tpu.vector_store %arg7[%c0_10, %c0_11], %12 {strides = array<i32>} : memref<128x32xf32, #tpu.memory_space<vmem>>, vector<128x32xf32>,
    } else {
    }
    %c0 = arith.constant 0 : index
    %c0_1 = arith.constant 0 : index
    %3 = vector.load %arg7[%c0, %c0_1] : memref<128x32xf32, #tpu.memory_space<vmem>>, vector<128x32xf32>
    %c0_2 = arith.constant 0 : index
    %c0_3 = arith.constant 0 : index
    %4 = vector.load %arg2[%c0_2, %c0_3] : memref<128x128xbf16, #tpu.memory_space<vmem>>, vector<128x128xbf16>
    %c0_4 = arith.constant 0 : index
    %c0_5 = arith.constant 0 : index
    %5 = vector.load %arg3[%c0_4, %c0_5] : memref<128x32xbf16, #tpu.memory_space<vmem>>, vector<128x32xbf16>
    %cst = arith.constant dense<0.000000e+00> : vector<128x32xf32>
    %6 = tpu.matmul %4, %5, %cst {dimension_numbers = #tpu.dot_dimension_numbers<[1], [0], [0], [1], [0, 0, 1, 1], [], []>} : vector<128x128xbf16>, vector<128x32xbf16>, vector<128x32xf32> -> vector<128x32xf32>
    %7 = arith.addf %3, %6 : vector<128x32xf32>
    %c0_6 = arith.constant 0 : index
    %c0_7 = arith.constant 0 : index
    %8 = vector.load %arg7[%c0_6, %c0_7] : memref<128x32xf32, #tpu.memory_space<vmem>>, vector<128x32xf32>
    tpu.vector_store %arg7[%c0_6, %c0_7], %7 {strides = array<i32>} : memref<128x32xf32, #tpu.memory_space<vmem>>, vector<128x32xf32>,
    %c1_i32 = arith.constant 1 : i32
    %9 = arith.cmpi eq, %arg1, %c1_i32 : i32
    %10 = arith.extui %9 : i1 to i32
    %c0_i32_8 = arith.constant 0 : i32
    %11 = arith.cmpi ne, %10, %c0_i32_8 : i32
    scf.if %11 {
      %c0_9 = arith.constant 0 : index
      %c0_10 = arith.constant 0 : index
      %12 = vector.load %arg7[%c0_9, %c0_10] : memref<128x32xf32, #tpu.memory_space<vmem>>, vector<128x32xf32>
      %13 = arith.truncf %12 : vector<128x32xf32> to vector<128x32xbf16>
      %c0_11 = arith.constant 0 : index
      %c0_12 = arith.constant 0 : index
      %14 = vector.load %arg4[%c0_11, %c0_12] : memref<32x128xbf16, #tpu.memory_space<vmem>>, vector<32x128xbf16>
      %cst_13 = arith.constant dense<0.000000e+00> : vector<128x128xf32>
      %15 = tpu.matmul %13, %14, %cst_13 {dimension_numbers = #tpu.dot_dimension_numbers<[1], [0], [0], [1], [0, 0, 1, 1], [], []>} : vector<128x32xbf16>, vector<32x128xbf16>, vector<128x128xf32> -> vector<128x128xf32>
      %c0_14 = arith.constant 0 : index
      %c0_15 = arith.constant 0 : index
      %16 = vector.load %arg5[%c0_14, %c0_15] : memref<1x128xf32, #tpu.memory_space<vmem>>, vector<1x128xf32>
      %17 = vector.broadcast %16 : vector<1x128xf32> to vector<128x128xf32>
      %18 = arith.addf %15, %17 : vector<128x128xf32>
      %c0_16 = arith.constant 0 : index
      %c0_17 = arith.constant 0 : index
      %19 = vector.load %arg6[%c0_16, %c0_17] : memref<128x128xf32, #tpu.memory_space<vmem>>, vector<128x128xf32>
      tpu.vector_store %arg6[%c0_16, %c0_17], %18 {strides = array<i32>} : memref<128x128xf32, #tpu.memory_space<vmem>>, vector<128x128xf32>,
    } else {
    }
    return
  }
  func.func @transform_0(%arg0: i32, %arg1: i32) -> (i32, i32) {
    %c0_i32 = arith.constant 0 : i32
    return %arg0, %arg1 : i32, i32
  }
  func.func @transform_1(%arg0: i32, %arg1: i32) -> (i32, i32) {
    %c0_i32 = arith.constant 0 : i32
    %c0_i32_0 = arith.constant 0 : i32
    return %arg1, %c0_i32 : i32, i32
  }
  func.func @transform_2(%arg0: i32, %arg1: i32) -> (i32, i32) {
    %c0_i32 = arith.constant 0 : i32
    %c0_i32_0 = arith.constant 0 : i32
    %c0_i32_1 = arith.constant 0 : i32
    return %c0_i32, %c0_i32_0 : i32, i32
  }
  func.func @transform_3(%arg0: i32, %arg1: i32) -> (i32, i32) {
    %c0_i32 = arith.constant 0 : i32
    %c0_i32_0 = arith.constant 0 : i32
    %c0_i32_1 = arith.constant 0 : i32
    return %c0_i32, %c0_i32_0 : i32, i32
  }
  func.func @transform_4(%arg0: i32, %arg1: i32) -> (i32, i32) {
    %c0_i32 = arith.constant 0 : i32
    %c0_i32_0 = arith.constant 0 : i32
    return %arg0, %c0_i32 : i32, i32
  }
}

</mosaic_0001>

<bundles_post_ra>
// kernel: graph_convolution.1
= control target key start
LH: loop header
LB: loop body
LE: loop exit
PB: predicated region body
PF: predicated region fallthrough
CT: control target
= control target key end

     0   :  { %s1213_s15 = smov 0   ;;  %s1215_s16 = smov 0   ;;  %s1412_s0 = inlined_call_operand.vmem [shape: bf16[256,256], index: 0, kind: input, shape index: {}]   ;;  %s1413_s1 = inlined_call_operand.vmem [shape: bf16[256,32], index: 1, kind: input, shape index: {}]   ;;  %s1414_s2 = inlined_call_operand.vmem [shape: bf16[32,128], index: 2, kind: input, shape index: {}]   ;;  %s1415_s3 = inlined_call_operand.vmem [shape: f32[1,128], index: 3, kind: input, shape index: {}]   ;;  %s1416_s4 = inlined_call_operand.vmem [shape: f32[256,128], index: 4, kind: output, shape index: {}]  }
   0x1   :  { %s1217_s17 = smov 0   ;;  %s1219_s18 = smov 0  }
   0x2   :  { %s1221_s19 = smov 0   ;;  %s1223_s20 = smov 0  }
   0x3   :  { %s1225_s21 = smov 0  }
   0x4 LB: > { %s23_s22 = sadd.s32 1, %s1177_s19  ;;  %s26_s23 = sadd.s32 1, %s1181_s20  ;;  %s1185_s21 = sphi %s1225_s21, %s14_s21   ;;  %s1181_s20 = sphi %s1223_s20, %s1422_s20   ;;  %s1177_s19 = sphi %s1221_s19, %s1421_s19   ;;  %s1173_s18 = sphi %s1219_s18, %s1420_s18   ;;  %s1169_s17 = sphi %s1217_s17, %s1419_s17   ;;  %s1165_s16 = sphi %s1215_s16, %s1418_s16   ;;  %s1161_s15 = sphi %s1213_s15, %s1417_s15  }
   0x5   : > { %p24_p0 = scmp.ge.s32.totalorder %s23_s22, 2  ;;  %p42_p1 = scmp.ne.s32.totalorder %s1165_s16, %s1161_s15 }
   0x6   : > { %p43_p2 = scmp.eq.s32.totalorder %s1185_s21, 0  ;;  %s35_s27 = sadd.s32 1, %s1165_s16 }
   0x7   : > { %s1424_s22 = smov (%p24_p0, %s23_s22), 0  ;;  %s1426_s23 = smov (!%p24_p0, %s26_s23), %s1181_s20 }
   0x8   : > { %p44_p3 = por %p43_p2, %p42_p1  ;;  %p28_p4 = scmp.ge.s32.totalorder %s1426_s23, 2 }
   0x9   : > { %s31_s24 = ssub.s32 %s1177_s19, %s1424_s22  ;;  %p915_p6 = scmp.ge.s32.totalorder %s1185_s21, 4 }
   0xa   : > { %s1428_s23 = smov (%p28_p4, %s1426_s23), 0 }
   0xb   : > { %s30_s25 = ssub.s32 %s1181_s20, %s1428_s23  ;;  %168 = sbr.rel (%p915_p6) target bundleno = 34 (0x22), region = 24 }
   0xc   : > { %s32_s26 = sor.u32 %s31_s24, %s30_s25 }
   0xd   : > { %p33_p5 = scmp.eq.s32.totalorder %s32_s26, 0 }
   0xf   : > { %s1264_s28 = scalar_select %p33_p5, %s1165_s16, %s35_s27  }
  0x12   : > { %171 = sbr.rel (!%p44_p3) target bundleno = 34 (0x22), region = 28  ;;  %s173_s29 = sand.u32 (%p44_p3), 1, %s1165_s16  }
  0x13   : > { %s957_s30 = sshll.u32 (%p44_p3), %s1181_s20, 5  ;;  %s916_s5 = sshll.u32 (%p44_p3), %s173_s29, 6 }
  0x14   : > { %s178_s6 = sadd.s32 (%p44_p3), %s1177_s19, %s957_s30  ;;  %s175_s11 = scalar_lea.vmem (%p44_p3), [#allocation3], %s916_s5 }
  0x15   : > { %s919_s7 = sshll.u32 (%p44_p3), %s178_s6, 2 }
  0x16   : > { %s1273_s10 = scalar_lea.vmem (%p44_p3), %s1412_s0, %s919_s7 }
  0x17   : > { %v196_v0 = vld [vmem:[%s1273_s10] sm:$0xf] (%p44_p3)  ;;  %v198_v1 = vld [vmem:[%s1273_s10 + $0x8] sm:$0xf] (%p44_p3)  ;;  %v200_v2 = vld [vmem:[%s1273_s10 + $0x10] sm:$0xf] (%p44_p3) }
  0x18   : > { %197 = vst [vmem:[%s175_s11] sm:$0xf] (%p44_p3), %v196_v0  ;;  %199 = vst [vmem:[%s175_s11 + $0x4] sm:$0xf] (%p44_p3), %v198_v1  ;;  %v202_v3 = vld [vmem:[%s1273_s10 + $0x18] sm:$0xf] (%p44_p3) }
  0x19   : > { %201 = vst [vmem:[%s175_s11 + $0x8] sm:$0xf] %v200_v2  ;;  %v204_v4 = vld [vmem:[%s1273_s10 + $0x20] sm:$0xf]  ;;  %v206_v5 = vld [vmem:[%s1273_s10 + $0x28] sm:$0xf] }
  0x1a   : > { %203 = vst [vmem:[%s175_s11 + $0xc] sm:$0xf] %v202_v3  ;;  %205 = vst [vmem:[%s175_s11 + $0x10] sm:$0xf] %v204_v4  ;;  %v208_v6 = vld [vmem:[%s1273_s10 + $0x30] sm:$0xf] }
  0x1b   : > { %207 = vst [vmem:[%s175_s11 + $0x14] sm:$0xf] %v206_v5  ;;  %v210_v7 = vld [vmem:[%s1273_s10 + $0x38] sm:$0xf]  ;;  %v212_v8 = vld [vmem:[%s1273_s10 + $0x40] sm:$0xf] }
  0x1c   : > { %209 = vst [vmem:[%s175_s11 + $0x18] sm:$0xf] %v208_v6  ;;  %211 = vst [vmem:[%s175_s11 + $0x1c] sm:$0xf] %v210_v7  ;;  %v214_v9 = vld [vmem:[%s1273_s10 + $0x48] sm:$0xf] }
  0x1d   : > { %213 = vst [vmem:[%s175_s11 + $0x20] sm:$0xf] %v212_v8  ;;  %v216_v10 = vld [vmem:[%s1273_s10 + $0x50] sm:$0xf]  ;;  %v218_v11 = vld [vmem:[%s1273_s10 + $0x58] sm:$0xf] }
  0x1e   : > { %215 = vst [vmem:[%s175_s11 + $0x24] sm:$0xf] %v214_v9  ;;  %217 = vst [vmem:[%s175_s11 + $0x28] sm:$0xf] %v216_v10  ;;  %v220_v12 = vld [vmem:[%s1273_s10 + $0x60] sm:$0xf] }
  0x1f   : > { %219 = vst [vmem:[%s175_s11 + $0x2c] sm:$0xf] %v218_v11  ;;  %v222_v13 = vld [vmem:[%s1273_s10 + $0x68] sm:$0xf]  ;;  %v224_v14 = vld [vmem:[%s1273_s10 + $0x70] sm:$0xf] }
  0x20   : > { %221 = vst [vmem:[%s175_s11 + $0x30] sm:$0xf] %v220_v12  ;;  %223 = vst [vmem:[%s175_s11 + $0x34] sm:$0xf] %v222_v13  ;;  %v226_v15 = vld [vmem:[%s1273_s10 + $0x78] sm:$0xf] }
  0x21   : > { %225 = vst [vmem:[%s175_s11 + $0x38] sm:$0xf] %v224_v14  ;;  %227 = vst [vmem:[%s175_s11 + $0x3c] sm:$0xf] %v226_v15 }
  0x22 PF: > { %p920_p7 = scmp.ge.s32.totalorder %s1185_s21, 1  ;;  %p290_p8 = scmp.lt.s32.totalorder %s1185_s21, 5 }
  0x24   : > { %p291_p9 = pnand %p920_p7, %p290_p8 }
  0x25   : > { %s297_s12 = sand.u32 (!%p291_p9), 1, %s1161_s15   ;;  %s922_s13 = sshll.u32 (!%p291_p9), %s1169_s17, 4 }
  0x26   : > { %294 = sbr.rel (%p291_p9) target bundleno = 543 (0x21f), region = 73  ;;  %s921_s14 = sshll.u32 (!%p291_p9), %s297_s12, 6 }
  0x27   : > { %p329_p10 = scmp.lt.s32.totalorder (!%p291_p9), %s922_s13, 31  ;;  %s924_s24 = sshll.u32 (!%p291_p9), %s1173_s18, 4 }
  0x28   : > { %p335_p11 = scmp.lt.s32.totalorder (!%p291_p9), %s924_s24, 31  ;;  %s1306_s15 = scalar_lea.vmem (!%p291_p9), [#allocation3], %s921_s14 }
  0x29   : > { %p926_p12 = scmp.ne.s32.totalorder (!%p291_p9), %s1169_s17, 0 }
  0x2d   : > { %s1430_s13 = smov (!%p329_p10, %s922_s13), 31  ;;  %s1432_s24 = smov (!%p335_p11, %s924_s24), 31 }
  0x2e   : > { %s923_s25 = sshll.u32 %s1430_s13, 2  ;;  %s925_s30 = sshll.u32 %s1432_s24, 3  ;;  %vm345_vm0 = vcmask (!%p926_p12), 261120   ;;  %v1187_v16 = vmov (!%p926_p12), 0.0  }
  0x2f   : > { %s1299_s29 = scalar_lea.vmem %s1413_s1, %s923_s25  ;;  %s1304_s7 = scalar_lea.vmem %s1416_s4, %s925_s30  ;;  %346 = vst.msk [vmem:[#allocation2] sm:$0xff] (!%p926_p12), %vm345_vm0, %v1187_v16  ;;  %347 = vst.msk [vmem:[#allocation2 + $0x8] sm:$0xff] (!%p926_p12), %vm345_vm0, %v1187_v16 }
  0x30   : > { %344 = sbr.rel (%p926_p12) target bundleno = 55 (0x37), region = 81  ;;  %348 = vst.msk [vmem:[#allocation2 + $0x10] sm:$0xff] (!%p926_p12), %vm345_vm0, %v1187_v16  ;;  %349 = vst.msk [vmem:[#allocation2 + $0x18] sm:$0xff] (!%p926_p12), %vm345_vm0, %v1187_v16 }
  0x31   : > { %350 = vst.msk [vmem:[#allocation2 + $0x20] sm:$0xff] (!%p926_p12), %vm345_vm0, %v1187_v16  ;;  %351 = vst.msk [vmem:[#allocation2 + $0x28] sm:$0xff] (!%p926_p12), %vm345_vm0, %v1187_v16 }
  0x32   : > { %352 = vst.msk [vmem:[#allocation2 + $0x30] sm:$0xff] (!%p926_p12), %vm345_vm0, %v1187_v16  ;;  %353 = vst.msk [vmem:[#allocation2 + $0x38] sm:$0xff] (!%p926_p12), %vm345_vm0, %v1187_v16 }
  0x33   : > { %354 = vst.msk [vmem:[#allocation2 + $0x40] sm:$0xff] (!%p926_p12), %vm345_vm0, %v1187_v16  ;;  %355 = vst.msk [vmem:[#allocation2 + $0x48] sm:$0xff] (!%p926_p12), %vm345_vm0, %v1187_v16 }
  0x34   : > { %356 = vst.msk [vmem:[#allocation2 + $0x50] sm:$0xff] (!%p926_p12), %vm345_vm0, %v1187_v16  ;;  %357 = vst.msk [vmem:[#allocation2 + $0x58] sm:$0xff] (!%p926_p12), %vm345_vm0, %v1187_v16 }
  0x35   : > { %358 = vst.msk [vmem:[#allocation2 + $0x60] sm:$0xff] (!%p926_p12), %vm345_vm0, %v1187_v16  ;;  %359 = vst.msk [vmem:[#allocation2 + $0x68] sm:$0xff] (!%p926_p12), %vm345_vm0, %v1187_v16 }
  0x36   : > { %360 = vst.msk [vmem:[#allocation2 + $0x70] sm:$0xff] (!%p926_p12), %vm345_vm0, %v1187_v16  ;;  %361 = vst.msk [vmem:[#allocation2 + $0x78] sm:$0xff] (!%p926_p12), %vm345_vm0, %v1187_v16 }
  0x37 PF: > { %v1113_v17 = vld [vmem:[%s1299_s29] sm:$0xff]   ;;  %v1114_v18 = vld [vmem:[%s1299_s29 + $0x8] sm:$0xff]   ;;  %v1115_v19 = vld [vmem:[%s1299_s29 + $0x10] sm:$0xff]   ;;  %vm619_vm1 = vcmask 261120   ;;  %p943_p13 = scmp.ne.s32.totalorder %s1169_s17, 1 }
  0x38   : > { %984 = vmatprep.subr.bf16.mxu0 %v1113_v17  ;;  %1036 = vmatprep.subr.bf16.mxu1 %v1113_v17  ;;  %v1116_v20 = vld [vmem:[%s1299_s29 + $0x18] sm:$0xff]   ;;  %v1121_v21 = vld [vmem:[%s1306_s15] sm:$0xff]   ;;  %v1118_v24 = vld [vmem:[%s1299_s29 + $0x28] sm:$0xff]  }
  0x39   : > { %985 = vmatpush3.bf16.msra.mxu0 %v1113_v17  ;;  %1044 = vmatpush3.bf16.msra.mxu1 %v1113_v17  ;;  %v1122_v22 = vld [vmem:[%s1306_s15 + $0x20] sm:$0xff]   ;;  %v1119_v25 = vld [vmem:[%s1299_s29 + $0x30] sm:$0xff]   ;;  %v1120_v26 = vld [vmem:[%s1299_s29 + $0x38] sm:$0xff]  }
  0x3a   : > { %986 = vmatprep.subr.bf16.mxu0 %v1114_v18  ;;  %1037 = vmatprep.subr.bf16.mxu1 %v1114_v18  ;;  %v1117_v23 = vld [vmem:[%s1299_s29 + $0x20] sm:$0xff]   ;;  %v1123_v27 = vld [vmem:[%s1306_s15 + $0x8] sm:$0xff]   ;;  %v1125_v29 = vld [vmem:[%s1306_s15 + $0x10] sm:$0xff]  }
  0x3b   : > { %1000 = vmatprep.mubr.bf16.mxu0 %v1121_v21  ;;  %1008 = vmatprep.mubr.bf16.mxu1 %v1122_v22  ;;  %v1124_v28 = vld [vmem:[%s1306_s15 + $0x28] sm:$0xff]   ;;  %v1126_v30 = vld [vmem:[%s1306_s15 + $0x30] sm:$0xff]   ;;  %v1127_v31 = vld [vmem:[%s1306_s15 + $0x18] sm:$0xff]  }
  0x3c   : > { %v1128_v32 = vld [vmem:[%s1306_s15 + $0x38] sm:$0xff]   ;;  %v364_v33 = vld [vmem:[#allocation2 + $0x10] sm:$0xff]  ;;  %v362_v35 = vld [vmem:[#allocation2] sm:$0xff] }
  0x3d   : > { %987 = vmatpush3.bf16.msra.mxu0 %v1114_v18  ;;  %1045 = vmatpush3.bf16.msra.mxu1 %v1114_v18  ;;  %v372_v34 = vld [vmem:[#allocation2 + $0x50] sm:$0xff]  ;;  %v370_v36 = vld [vmem:[#allocation2 + $0x40] sm:$0xff]  ;;  %v365_v39 = vld [vmem:[#allocation2 + $0x18] sm:$0xff] }
  0x3e   : > { %988 = vmatprep.subr.bf16.mxu0 %v1115_v19  ;;  %1038 = vmatprep.subr.bf16.mxu1 %v1115_v19  ;;  %v373_v40 = vld [vmem:[#allocation2 + $0x58] sm:$0xff]  ;;  %v363_v45 = vld [vmem:[#allocation2 + $0x8] sm:$0xff]  ;;  %v368_v57 = vld [vmem:[#allocation2 + $0x30] sm:$0xff] }
  0x3f   : > { %v371_v46 = vld [vmem:[#allocation2 + $0x48] sm:$0xff]  ;;  %v376_v58 = vld [vmem:[#allocation2 + $0x70] sm:$0xff]  ;;  %v366_v59 = vld [vmem:[#allocation2 + $0x20] sm:$0xff] }
  0x40   : > { %v374_v60 = vld [vmem:[#allocation2 + $0x60] sm:$0xff]  ;;  %v369_v63 = vld [vmem:[#allocation2 + $0x38] sm:$0xff]  ;;  %v367_v5 = vld [vmem:[#allocation2 + $0x28] sm:$0xff] }
  0x41   : > { %989 = vmatpush3.bf16.msra.mxu0 %v1115_v19  ;;  %1046 = vmatpush3.bf16.msra.mxu1 %v1115_v19  ;;  %v377_v0 = vld [vmem:[#allocation2 + $0x78] sm:$0xff]  ;;  %v375_v6 = vld [vmem:[#allocation2 + $0x68] sm:$0xff]  ;;  %v1129_v17 = vld [vmem:[%s1414_s2] sm:$0xff] (!%p943_p13)  }
  0x42   : > { %990 = vmatprep.subr.bf16.mxu0 %v1116_v20  ;;  %1039 = vmatprep.subr.bf16.mxu1 %v1116_v20  ;;  %v1130_v18 = vld [vmem:[%s1414_s2 + $0x8] sm:$0xff] (!%p943_p13)  }
  0x45   : > { %991 = vmatpush3.bf16.msra.mxu0 %v1116_v20  ;;  %1047 = vmatpush3.bf16.msra.mxu1 %v1116_v20 }
  0x46   : > { %992 = vmatprep.subr.bf16.mxu0 %v1117_v23  ;;  %1040 = vmatprep.subr.bf16.mxu1 %v1117_v23 }
  0x49   : > { %993 = vmatpush3.bf16.msra.mxu0 %v1117_v23  ;;  %1048 = vmatpush3.bf16.msra.mxu1 %v1117_v23 }
  0x4a   : > { %994 = vmatprep.subr.bf16.mxu0 %v1118_v24  ;;  %1041 = vmatprep.subr.bf16.mxu1 %v1118_v24 }
  0x4d   : > { %995 = vmatpush3.bf16.msra.mxu0 %v1118_v24  ;;  %1049 = vmatpush3.bf16.msra.mxu1 %v1118_v24 }
  0x4e   : > { %996 = vmatprep.subr.bf16.mxu0 %v1119_v25  ;;  %1042 = vmatprep.subr.bf16.mxu1 %v1119_v25 }
  0x51   : > { %997 = vmatpush3.bf16.msra.mxu0 %v1119_v25  ;;  %1050 = vmatpush3.bf16.msra.mxu1 %v1119_v25 }
  0x52   : > { %998 = vmatprep.subr.bf16.mxu0 %v1120_v26  ;;  %1043 = vmatprep.subr.bf16.mxu1 %v1120_v26 }
  0x55   : > { %999 = vmatpush3.bf16.msra.mxu0 %v1120_v26  ;;  %1051 = vmatpush3.bf16.msra.mxu1 %v1120_v26 }
  0x56   : > { %1016 = vmatprep.subr.bf16.mxu0 (!%p943_p13), %v1129_v17  ;;  %1052 = vmatprep.subr.bf16.mxu1 (!%p943_p13), %v1129_v17 }
  0x58   : > { %1001 = vmatmul.mubr.bf16.vlgmr.msra.gmra.mrb[0].mxu0 %v1123_v27  ;;  %1009 = vmatmul.mubr.bf16.vlgmr.msra.gmra.mrb[0].mxu1 %v1124_v28 }
  0x59   : > { %1004 = vmatprep.mubr.bf16.mxu0 %v1125_v29  ;;  %1012 = vmatprep.mubr.bf16.mxu1 %v1126_v30 }
  0x5a   : > { %1017 = vmatpush3.bf16.msra.mxu0 (!%p943_p13), %v1129_v17  ;;  %1054 = vmatpush3.bf16.msra.mxu1 (!%p943_p13), %v1129_v17 }
  0x5b   : > { %1018 = vmatprep.subr.bf16.mxu0 (!%p943_p13), %v1130_v18  ;;  %1053 = vmatprep.subr.bf16.mxu1 (!%p943_p13), %v1130_v18 }
  0x5e   : > { %1019 = vmatpush3.bf16.msra.mxu0 (!%p943_p13), %v1130_v18  ;;  %1055 = vmatpush3.bf16.msra.mxu1 (!%p943_p13), %v1130_v18 }
  0x60   : > { %1005 = vmatmul.mubr.bf16.gmra.mrb[4].mxu0 %v1127_v31  ;;  %1013 = vmatmul.mubr.bf16.gmra.mrb[4].mxu1 %v1128_v32 }
 0x12b   : > { %v1002_v37 = vpop.f32.mrb[0].mxu0  ;;  %v1010_v38 = vpop.f32.mrb[0].mxu1 }
 0x12c   : > { %v605_v41 = vadd.f32 %v1002_v37, %v364_v33  ;;  %v613_v42 = vadd.f32 %v1010_v38, %v372_v34  ;;  %v540_v43 = vpop.f32.mrb[1].mxu0  ;;  %v572_v44 = vpop.f32.mrb[1].mxu1 }
 0x12d   : > { %v603_v47 = vadd.f32 %v540_v43, %v362_v35  ;;  %v611_v48 = vadd.f32 %v572_v44, %v370_v36  ;;  %v1003_v49 = vpop.f32.mrb[2].mxu0  ;;  %v1011_v50 = vpop.f32.mrb[2].mxu1  ;;  %v944_v43 = vld [vmem:[%s1415_s3] ss:$0 sm:$0xff] (!%p943_p13) }
 0x12e   : > { %622 = vst.msk [vmem:[#allocation2 + $0x10] sm:$0xff] %vm619_vm1, %v605_v41  ;;  %630 = vst.msk [vmem:[#allocation2 + $0x50] sm:$0xff] %vm619_vm1, %v613_v42  ;;  %v606_v51 = vadd.f32 %v1003_v49, %v365_v39  ;;  %v614_v52 = vadd.f32 %v1011_v50, %v373_v40  ;;  %v543_v53 = vpop.f32.mrb[3].mxu0  ;;  %v575_v54 = vpop.f32.mrb[3].mxu1 }
 0x12f   : > { %620 = vst.msk [vmem:[#allocation2] sm:$0xff] %vm619_vm1, %v603_v47  ;;  %628 = vst.msk [vmem:[#allocation2 + $0x40] sm:$0xff] %vm619_vm1, %v611_v48  ;;  %v604_v55 = vadd.f32 %v543_v53, %v363_v45  ;;  %v612_v56 = vadd.f32 %v575_v54, %v371_v46 }
 0x130   : > { %623 = vst.msk [vmem:[#allocation2 + $0x18] sm:$0xff] %vm619_vm1, %v606_v51  ;;  %631 = vst.msk [vmem:[#allocation2 + $0x58] sm:$0xff] %vm619_vm1, %v614_v52 }
 0x131   : > { %621 = vst.msk [vmem:[#allocation2 + $0x8] sm:$0xff] %vm619_vm1, %v604_v55  ;;  %629 = vst.msk [vmem:[#allocation2 + $0x48] sm:$0xff] %vm619_vm1, %v612_v56 }
 0x133   : > { %v1006_v61 = vpop.f32.mrb[4].mxu0  ;;  %v1014_v62 = vpop.f32.mrb[4].mxu1  ;;  %639 = sbr.rel (%p943_p13) target bundleno = 543 (0x21f), region = 85 }
 0x134   : > { %v609_v1 = vadd.f32 %v1006_v61, %v368_v57  ;;  %v617_v2 = vadd.f32 %v1014_v62, %v376_v58  ;;  %v556_v3 = vpop.f32.mrb[5].mxu0  ;;  %v588_v4 = vpop.f32.mrb[5].mxu1 }
 0x135   : > { %v607_v7 = vadd.f32 %v556_v3, %v366_v59  ;;  %v615_v8 = vadd.f32 %v588_v4, %v374_v60  ;;  %v1007_v9 = vpop.f32.mrb[6].mxu0  ;;  %v1015_v10 = vpop.f32.mrb[6].mxu1  ;;  %v642_v24 = vld [vmem:[#allocation2 + $0x10] sm:$0xff] (!%p943_p13) }
 0x136   : > { %626 = vst.msk [vmem:[#allocation2 + $0x30] sm:$0xff] %vm619_vm1, %v609_v1  ;;  %634 = vst.msk [vmem:[#allocation2 + $0x70] sm:$0xff] %vm619_vm1, %v617_v2  ;;  %v610_v11 = vadd.f32 %v1007_v9, %v369_v63  ;;  %v618_v12 = vadd.f32 %v1015_v10, %v377_v0  ;;  %v559_v13 = vpop.f32.mrb[7].mxu0  ;;  %v591_v14 = vpop.f32.mrb[7].mxu1  ;;  %v640_v19 = vld [vmem:[#allocation2] sm:$0xff] (!%p943_p13)  ;;  %v650_v27 = vld [vmem:[#allocation2 + $0x50] sm:$0xff] (!%p943_p13) }
 0x137   : > { %624 = vst.msk [vmem:[#allocation2 + $0x20] sm:$0xff] %vm619_vm1, %v607_v7  ;;  %632 = vst.msk [vmem:[#allocation2 + $0x60] sm:$0xff] %vm619_vm1, %v615_v8  ;;  %v608_v15 = vadd.f32 %v559_v13, %v367_v5  ;;  %v616_v16 = vadd.f32 %v591_v14, %v375_v6  ;;  %v648_v21 = vld [vmem:[#allocation2 + $0x40] sm:$0xff] (!%p943_p13)  ;;  %v643_v25 = vld [vmem:[#allocation2 + $0x18] sm:$0xff] (!%p943_p13) }
 0x138   : > { %627 = vst.msk [vmem:[#allocation2 + $0x38] sm:$0xff] %vm619_vm1, %v610_v11  ;;  %635 = vst.msk [vmem:[#allocation2 + $0x78] sm:$0xff] %vm619_vm1, %v618_v12  ;;  %v641_v20 = vld [vmem:[#allocation2 + $0x8] sm:$0xff] (!%p943_p13)  ;;  %v651_v28 = vld [vmem:[#allocation2 + $0x58] sm:$0xff] (!%p943_p13)  ;;  %v657_v33 = vpack.c.bf16 (!%p943_p13), %v643_v25, %v642_v24 }
 0x139   : > { %625 = vst.msk [vmem:[#allocation2 + $0x28] sm:$0xff] %vm619_vm1, %v608_v15  ;;  %633 = vst.msk [vmem:[#allocation2 + $0x68] sm:$0xff] %vm619_vm1, %v616_v16  ;;  %v656_v22 = vpack.c.bf16 (!%p943_p13), %v641_v20, %v640_v19  ;;  %v649_v23 = vld [vmem:[#allocation2 + $0x48] sm:$0xff] (!%p943_p13)  ;;  %v661_v34 = vpack.c.bf16 (!%p943_p13), %v651_v28, %v650_v27 }
 0x13a   : > { %v660_v26 = vpack.c.bf16 %v649_v23, %v648_v21 }
 0x13b   : > { %1020 = vmatprep.mubr.msk.bf16.mxu0 %vm619_vm1, %v656_v22 }
 0x13c   : > { %1028 = vmatprep.mubr.msk.bf16.mxu1 %vm619_vm1, %v660_v26  ;;  %1021 = vmatmul.mubr.msk.bf16.vlgmr.msra.gmra.mrb[0].mxu0 %vm619_vm1, %v657_v33 }
 0x13d   : > { %1029 = vmatmul.mubr.msk.bf16.vlgmr.msra.gmra.mrb[0].mxu1 %vm619_vm1, %v661_v34  ;;  %v646_v37 = vld [vmem:[#allocation2 + $0x30] sm:$0xff] }
 0x13e   : > { %v644_v29 = vld [vmem:[#allocation2 + $0x20] sm:$0xff]  ;;  %v654_v39 = vld [vmem:[#allocation2 + $0x70] sm:$0xff] }
 0x13f   : > { %v652_v31 = vld [vmem:[#allocation2 + $0x60] sm:$0xff]  ;;  %v647_v38 = vld [vmem:[#allocation2 + $0x38] sm:$0xff] }
 0x140   : > { %v645_v30 = vld [vmem:[#allocation2 + $0x28] sm:$0xff]  ;;  %v655_v40 = vld [vmem:[#allocation2 + $0x78] sm:$0xff]  ;;  %v659_v41 = vpack.c.bf16 %v647_v38, %v646_v37 }
 0x141   : > { %v653_v32 = vld [vmem:[#allocation2 + $0x68] sm:$0xff]  ;;  %v658_v35 = vpack.c.bf16 %v645_v30, %v644_v29  ;;  %v663_v42 = vpack.c.bf16 %v655_v40, %v654_v39 }
 0x142   : > { %v662_v36 = vpack.c.bf16 %v653_v32, %v652_v31 }
 0x143   : > { %1024 = vmatprep.mubr.msk.bf16.mxu0 %vm619_vm1, %v658_v35 }
 0x144   : > { %1032 = vmatprep.mubr.msk.bf16.mxu1 %vm619_vm1, %v662_v36  ;;  %1025 = vmatmul.mubr.msk.bf16.gmra.mrb[4].mxu0 %vm619_vm1, %v659_v41 }
 0x145   : > { %1033 = vmatmul.mubr.msk.bf16.gmra.mrb[4].mxu1 %vm619_vm1, %v663_v42 }
 0x20f   : > { %v1022_v44 = vpop.f32.mrb[0].mxu0 }
 0x210   : > { %v1030_v45 = vpop.f32.mrb[0].mxu1  ;;  %v754_v46 = vadd.f32 %v1022_v44, %v944_v43  ;;  %v745_v48 = vpop.f32.mrb[1].mxu0 }
 0x211   : > { %v786_v47 = vadd.f32 %v1030_v45, %v944_v43  ;;  %v777_v49 = vpop.f32.mrb[1].mxu1  ;;  %v746_v50 = vadd.f32 %v944_v43, %v745_v48  ;;  %v1023_v52 = vpop.f32.mrb[2].mxu0 }
 0x212   : > { %v778_v51 = vadd.f32 %v944_v43, %v777_v49  ;;  %v1031_v53 = vpop.f32.mrb[2].mxu1  ;;  %810 = vst [vmem:[%s1304_s7 + $0x10] sm:$0xff] %v754_v46  ;;  %v757_v54 = vadd.f32 %v1023_v52, %v944_v43  ;;  %v748_v56 = vpop.f32.mrb[3].mxu0 }
 0x213   : > { %818 = vst [vmem:[%s1304_s7 + $0x50] sm:$0xff] %v786_v47  ;;  %v789_v55 = vadd.f32 %v1031_v53, %v944_v43  ;;  %v780_v57 = vpop.f32.mrb[3].mxu1  ;;  %808 = vst [vmem:[%s1304_s7] sm:$0xff] %v746_v50  ;;  %v749_v58 = vadd.f32 %v944_v43, %v748_v56 }
 0x214   : > { %816 = vst [vmem:[%s1304_s7 + $0x40] sm:$0xff] %v778_v51  ;;  %v781_v59 = vadd.f32 %v944_v43, %v780_v57  ;;  %811 = vst [vmem:[%s1304_s7 + $0x18] sm:$0xff] %v757_v54 }
 0x215   : > { %819 = vst [vmem:[%s1304_s7 + $0x58] sm:$0xff] %v789_v55  ;;  %809 = vst [vmem:[%s1304_s7 + $0x8] sm:$0xff] %v749_v58 }
 0x216   : > { %817 = vst [vmem:[%s1304_s7 + $0x48] sm:$0xff] %v781_v59 }
 0x217   : > { %v1026_v60 = vpop.f32.mrb[4].mxu0 }
 0x218   : > { %v1034_v61 = vpop.f32.mrb[4].mxu1  ;;  %v770_v62 = vadd.f32 %v1026_v60, %v944_v43  ;;  %v761_v0 = vpop.f32.mrb[5].mxu0 }
 0x219   : > { %v802_v63 = vadd.f32 %v1034_v61, %v944_v43  ;;  %v793_v1 = vpop.f32.mrb[5].mxu1  ;;  %v762_v2 = vadd.f32 %v944_v43, %v761_v0  ;;  %v1027_v4 = vpop.f32.mrb[6].mxu0 }
 0x21a   : > { %v794_v3 = vadd.f32 %v944_v43, %v793_v1  ;;  %v1035_v5 = vpop.f32.mrb[6].mxu1  ;;  %814 = vst [vmem:[%s1304_s7 + $0x30] sm:$0xff] %v770_v62  ;;  %v773_v6 = vadd.f32 %v1027_v4, %v944_v43  ;;  %v764_v8 = vpop.f32.mrb[7].mxu0 }
 0x21b   : > { %822 = vst [vmem:[%s1304_s7 + $0x70] sm:$0xff] %v802_v63  ;;  %v805_v7 = vadd.f32 %v1035_v5, %v944_v43  ;;  %v796_v9 = vpop.f32.mrb[7].mxu1  ;;  %812 = vst [vmem:[%s1304_s7 + $0x20] sm:$0xff] %v762_v2  ;;  %v765_v10 = vadd.f32 %v944_v43, %v764_v8 }
 0x21c   : > { %820 = vst [vmem:[%s1304_s7 + $0x60] sm:$0xff] %v794_v3  ;;  %v797_v11 = vadd.f32 %v944_v43, %v796_v9  ;;  %815 = vst [vmem:[%s1304_s7 + $0x38] sm:$0xff] %v773_v6 }
 0x21d   : > { %823 = vst [vmem:[%s1304_s7 + $0x78] sm:$0xff] %v805_v7  ;;  %813 = vst [vmem:[%s1304_s7 + $0x28] sm:$0xff] %v765_v10 }
 0x21e   : > { %821 = vst [vmem:[%s1304_s7 + $0x68] sm:$0xff] %v797_v11 }
 0x21f PF: > { %s14_s21 = sadd.s32 1, %s1185_s21   ;;  %s1417_s15 = smov %s1165_s16 }
 0x220   : > { %p11_p0 = scmp.ge.s32.totalorder %s14_s21, 6   ;;  %s1418_s16 = smov %s1264_s28 }
 0x221   : > { %s1419_s17 = smov %s1177_s19  ;;  %s1420_s18 = smov %s1181_s20 }
 0x222   : > { %s1421_s19 = smov %s1424_s22  ;;  %s1422_s20 = smov %s1428_s23 }
 0x223   :  { %13 = sbr.rel (!%p11_p0) target bundleno = 4 (0x4), region = 123 }

</bundles_post_ra>
